<compile_context>
chip_gen: v6e
topology: v6e:2x2x1
jax: 0.10.0
libtpu: 0.0.40
codegen_flags: <defaults>
</compile_context>

<pallas_src>
import functools
import math

import jax
import jax.numpy as jnp
from jax import lax
from jax.experimental import pallas as pl
from jax.experimental.pallas import tpu as pltpu


def _round_up(x, m):
    return ((x + m - 1) // m) * m


# ---------------------------------------------------------------------------
# Fast path: table resident in VMEM, gather via dynamic row reads (no DMA).
# ---------------------------------------------------------------------------
def _embed_vmem_kernel(ids_ref, tab_ref, out_ref, *, tile_n, scale):
    """ids_ref: (N_pad,) i32 SMEM; tab_ref: (V, E) VMEM (resident); out_ref: (tile_n, E) VMEM."""
    base = pl.program_id(0) * tile_n

    def body(t, carry):
        row = ids_ref[base + t]
        # sqrt(E) fused into the store; no scratch buffer, no extra pass.
        out_ref[pl.ds(t, 1), :] = tab_ref[pl.ds(row, 1), :] * scale
        return carry

    # Unrolled so the SMEM id load, table read and store co-issue.
    lax.fori_loop(0, tile_n, body, 0, unroll=8)


# ---------------------------------------------------------------------------
# HBM path: per-row DMA gather with cross-tile double buffering.
# ---------------------------------------------------------------------------
def _gather_hbm_kernel(ids_ref, tab_hbm, out_ref, buf, sems, *, tile_n, scale):
    """ids_ref: (N_pad,) i32 SMEM; tab_hbm: (V, E) HBM ref; out_ref: (tile_n, E) VMEM;
    buf: (2, tile_n, E) VMEM double buffer; sems: (2,) DMA semaphores (one per slot)."""
    i = pl.program_id(0)
    n_tiles = pl.num_programs(0)

    def issue_tile(tile_idx, slot):
        base = tile_idx * tile_n

        def body(t, carry):
            row = ids_ref[base + t]
            pltpu.make_async_copy(
                tab_hbm.at[pl.ds(row, 1), :],
                buf.at[slot, pl.ds(t, 1), :],
                sems.at[slot],            # shared per-slot semaphore (no per-row sems)
            ).start()
            return carry

        # Unrolled issue loop; tile_n bounds the in-flight descriptor count.
        lax.fori_loop(0, tile_n, body, 0, unroll=8)

    # Prime: the first grid step issues its own tile's gathers.
    @pl.when(i == 0)
    def _():
        issue_tile(0, 0)

    slot = i % 2

    # Cross-tile overlap: start next tile's gathers before waiting on this one.
    @pl.when(i + 1 < n_tiles)
    def _():
        issue_tile(i + 1, 1 - slot)

    # One aggregate wait for this tile's bytes (tile_n rows x E elements), all signaled
    # on the same per-slot DMA semaphore -> O(1) waits per tile.
    pltpu.make_async_copy(
        tab_hbm.at[pl.ds(0, tile_n), :],   # shape / byte-count only
        buf.at[slot],
        sems.at[slot],
    ).wait()

    # sqrt(E) fused into the writeback: single VMEM read + single store.
    out_ref[...] = buf[slot] * scale


# ---------------------------------------------------------------------------
# Wrapper
# ---------------------------------------------------------------------------
def token_embedding(tokens, table, *, tile_n_max=256, force_hbm_gather=False):
    """tokens: int array (any shape); table: (V, E). Returns table[tokens] * sqrt(E)."""
    V, E = table.shape
    lead_shape = tokens.shape
    N = int(math.prod(lead_shape)) if lead_shape else 1
    scale = float(math.sqrt(E))
    itemsize = jnp.dtype(table.dtype).itemsize
    tile_n_max = max(8, (int(tile_n_max) // 8) * 8)

    # Clamp ids (PyTorch nn.Embedding raises on OOB; we clamp to keep lookups in bounds).
    ids = jnp.clip(tokens.reshape(-1).astype(jnp.int32), 0, V - 1)
    # NOTE: ids live in SMEM via scalar prefetch; chunk N over several calls if the token
    # count grows into the hundreds of thousands.  # TODO(synk): wrapper-level chunking.

    # Tile size: multiple of 8, capped, but small enough that small problems still give
    # several grid steps (keeps both v7x TensorCores busy on the parallel axis).
    tile_n = max(8, min(tile_n_max, _round_up(max(1, (N + 7) // 8), 8)))

    # Per-generation VMEM budget for the resident-table fast path (assume the pipeline
    # may hold 2 copies of the table plus double-buffered output tiles).
    try:
        vmem_cap = int(pltpu.get_tpu_info().vmem_capacity_bytes)
    except Exception:
        vmem_cap = 64 << 20   # v7x per-TensorCore VMEM: the smallest generation.
    table_bytes = V * E * itemsize
    tile_bytes = tile_n * E * itemsize
    fast_budget = min(int(0.75 * vmem_cap), 96 << 20)   # ~48 MiB of table on v7x, ~96 on v5e/v6e
    use_vmem_table = (not force_hbm_gather) and (2 * table_bytes + 4 * tile_bytes <= fast_budget)

    if not use_vmem_table and V >= 8:
        # Keep the aggregate-wait descriptor (tab[0:tile_n]) in bounds for tiny-V tables.
        tile_n = min(tile_n, (V // 8) * 8)
        tile_bytes = tile_n * E * itemsize

    n_tiles = (N + tile_n - 1) // tile_n
    n_pad = n_tiles * tile_n
    if n_pad != N:
        ids = jnp.concatenate([ids, jnp.zeros((n_pad - N,), jnp.int32)])

    if use_vmem_table:
        vmem_need = 2 * table_bytes + 6 * tile_bytes + (2 << 20)
        kernel = functools.partial(_embed_vmem_kernel, tile_n=tile_n, scale=scale)
        grid_spec = pltpu.PrefetchScalarGridSpec(
            num_scalar_prefetch=1,                                   # ids -> SMEM
            grid=(n_tiles,),
            in_specs=[pl.BlockSpec((V, E), lambda i, ids: (0, 0))],  # table resident in VMEM
            out_specs=pl.BlockSpec((tile_n, E), lambda i, ids: (i, 0)),
        )
        semantics = ("parallel",)                                    # megacore-shard token tiles
    else:
        vmem_need = 2 * 2 * tile_bytes + 6 * tile_bytes + (2 << 20)
        kernel = functools.partial(_gather_hbm_kernel, tile_n=tile_n, scale=scale)
        grid_spec = pltpu.PrefetchScalarGridSpec(
            num_scalar_prefetch=1,                                   # ids -> SMEM
            grid=(n_tiles,),
            in_specs=[pl.BlockSpec(memory_space=pl.ANY)],            # table stays in HBM
            out_specs=pl.BlockSpec((tile_n, E), lambda i, ids: (i, 0)),
            scratch_shapes=[
                pltpu.VMEM((2, tile_n, E), table.dtype),             # cross-tile double buffer
                pltpu.SemaphoreType.DMA((2,)),                       # one shared sem per slot
            ],
        )
        semantics = ("arbitrary",)   # cross-tile prefetch carries state between steps

    out = pl.pallas_call(
        kernel,
        out_shape=jax.ShapeDtypeStruct((n_pad, E), table.dtype),
        grid_spec=grid_spec,
        compiler_params=pltpu.CompilerParams(
            dimension_semantics=semantics,
            vmem_limit_bytes=min(vmem_cap, max(32 << 20, vmem_need)),
        ),
    )(ids, table)

    return out[:N].reshape(*lead_shape, E)


if __name__ == "__main__":
    # Module config (small, consistent with the forward pass): nn.Embedding(vocab+1, emb).
    vocab_size = 32
    emb_size = 32
    batch, seq = 2, 8

    key = jax.random.PRNGKey(0)
    k_tab, k_tok, k_tab2, k_tok2 = jax.random.split(key, 4)

    # nn.Embedding default init is N(0, 1).
    table = jax.random.normal(k_tab, (vocab_size + 1, emb_size), dtype=jnp.float32)
    tokens = jax.random.randint(k_tok, (batch, seq), 0, vocab_size + 1, dtype=jnp.int32)

    # 1) Main demo: VMEM-resident fast path.
    out = jax.block_until_ready(token_embedding(tokens, table))
    ref = table[tokens] * math.sqrt(emb_size)
    assert out.shape == (batch, seq, emb_size)
    assert jnp.allclose(out, ref, atol=1e-5, rtol=1e-5)

    # 2) Tail-tile handling: token count not divisible by the tile size.
    tokens_tail = tokens[:, :7]
    out_tail = jax.block_until_ready(token_embedding(tokens_tail, table))
    assert jnp.allclose(out_tail, table[tokens_tail] * math.sqrt(emb_size), atol=1e-5, rtol=1e-5)

    # 3) Force the HBM DMA-gather path (lane-dense E=256 -> 1 KiB row DMAs), 2 tiles so the
    #    cross-tile double buffering / aggregate-wait machinery is exercised.
    big_v, big_e = 512, 256
    table2 = jax.random.normal(k_tab2, (big_v, big_e), dtype=jnp.float32)
    tokens2 = jax.random.randint(k_tok2, (batch, seq), 0, big_v, dtype=jnp.int32)
    out2 = jax.block_until_ready(token_embedding(tokens2, table2, force_hbm_gather=True))
    assert jnp.allclose(out2, table2[tokens2] * math.sqrt(big_e), atol=1e-4, rtol=1e-5)

    print("KERNEL_OK")
</pallas_src>

<mosaic_0001>
module attributes {stable_mosaic.version = 11 : i64} {
  func.func @_embed_vmem_kernel(%arg0: i32, %arg1: memref<16xi32, #tpu.memory_space<smem>>, %arg2: memref<33x32xf32, #tpu.memory_space<vmem>>, %arg3: memref<8x32xf32, #tpu.memory_space<vmem>>) attributes {dimension_semantics = [#tpu.dimension_semantics<parallel>], iteration_bounds = array<i64: 2>, scalar_prefetch = 1 : i64, scratch_operands = 0 : i64, tpu.core_type = #tpu.core_type<tc>, window_params = [{pipeline_mode = #tpu.pipeline_mode<synchronous>, transform_indices = @transform_0, window_bounds = array<i64: 33, 32>}, {transform_indices = @transform_1, window_bounds = array<i64: 8, 32>}]} {
    %c8_i32 = arith.constant 8 : i32
    %0 = arith.muli %arg0, %c8_i32 : i32
    %c0_i32 = arith.constant 0 : i32
    %1 = arith.addi %0, %c0_i32 : i32
    %2 = arith.index_cast %1 : i32 to index
    %3 = memref.load %arg1[%2] : memref<16xi32, #tpu.memory_space<smem>>
    %4 = arith.index_cast %3 : i32 to index
    %c0 = arith.constant 0 : index
    %5 = vector.load %arg2[%4, %c0] : memref<33x32xf32, #tpu.memory_space<vmem>>, vector<1x32xf32>
    %cst = arith.constant 5.65685415 : f32
    %6 = vector.broadcast %cst : f32 to vector<1x32xf32>
    %7 = arith.mulf %5, %6 : vector<1x32xf32>
    %8 = arith.index_cast %c0_i32 : i32 to index
    %c0_0 = arith.constant 0 : index
    %9 = vector.load %arg3[%8, %c0_0] : memref<8x32xf32, #tpu.memory_space<vmem>>, vector<1x32xf32>
    tpu.vector_store %arg3[%8, %c0_0], %7 {strides = array<i32>} : memref<8x32xf32, #tpu.memory_space<vmem>>, vector<1x32xf32>,
    %c1_i32 = arith.constant 1 : i32
    %10 = arith.addi %0, %c1_i32 : i32
    %11 = arith.index_cast %10 : i32 to index
    %12 = memref.load %arg1[%11] : memref<16xi32, #tpu.memory_space<smem>>
    %13 = arith.index_cast %12 : i32 to index
    %c0_1 = arith.constant 0 : index
    %14 = vector.load %arg2[%13, %c0_1] : memref<33x32xf32, #tpu.memory_space<vmem>>, vector<1x32xf32>
    %cst_2 = arith.constant 5.65685415 : f32
    %15 = vector.broadcast %cst_2 : f32 to vector<1x32xf32>
    %16 = arith.mulf %14, %15 : vector<1x32xf32>
    %17 = arith.index_cast %c1_i32 : i32 to index
    %c0_3 = arith.constant 0 : index
    %18 = vector.load %arg3[%17, %c0_3] : memref<8x32xf32, #tpu.memory_space<vmem>>, vector<1x32xf32>
    tpu.vector_store %arg3[%17, %c0_3], %16 {strides = array<i32>} : memref<8x32xf32, #tpu.memory_space<vmem>>, vector<1x32xf32>,
    %c2_i32 = arith.constant 2 : i32
    %19 = arith.addi %0, %c2_i32 : i32
    %20 = arith.index_cast %19 : i32 to index
    %21 = memref.load %arg1[%20] : memref<16xi32, #tpu.memory_space<smem>>
    %22 = arith.index_cast %21 : i32 to index
    %c0_4 = arith.constant 0 : index
    %23 = vector.load %arg2[%22, %c0_4] : memref<33x32xf32, #tpu.memory_space<vmem>>, vector<1x32xf32>
    %cst_5 = arith.constant 5.65685415 : f32
    %24 = vector.broadcast %cst_5 : f32 to vector<1x32xf32>
    %25 = arith.mulf %23, %24 : vector<1x32xf32>
    %26 = arith.index_cast %c2_i32 : i32 to index
    %c0_6 = arith.constant 0 : index
    %27 = vector.load %arg3[%26, %c0_6] : memref<8x32xf32, #tpu.memory_space<vmem>>, vector<1x32xf32>
    tpu.vector_store %arg3[%26, %c0_6], %25 {strides = array<i32>} : memref<8x32xf32, #tpu.memory_space<vmem>>, vector<1x32xf32>,
    %c3_i32 = arith.constant 3 : i32
    %28 = arith.addi %0, %c3_i32 : i32
    %29 = arith.index_cast %28 : i32 to index
    %30 = memref.load %arg1[%29] : memref<16xi32, #tpu.memory_space<smem>>
    %31 = arith.index_cast %30 : i32 to index
    %c0_7 = arith.constant 0 : index
    %32 = vector.load %arg2[%31, %c0_7] : memref<33x32xf32, #tpu.memory_space<vmem>>, vector<1x32xf32>
    %cst_8 = arith.constant 5.65685415 : f32
    %33 = vector.broadcast %cst_8 : f32 to vector<1x32xf32>
    %34 = arith.mulf %32, %33 : vector<1x32xf32>
    %35 = arith.index_cast %c3_i32 : i32 to index
    %c0_9 = arith.constant 0 : index
    %36 = vector.load %arg3[%35, %c0_9] : memref<8x32xf32, #tpu.memory_space<vmem>>, vector<1x32xf32>
    tpu.vector_store %arg3[%35, %c0_9], %34 {strides = array<i32>} : memref<8x32xf32, #tpu.memory_space<vmem>>, vector<1x32xf32>,
    %c4_i32 = arith.constant 4 : i32
    %37 = arith.addi %0, %c4_i32 : i32
    %38 = arith.index_cast %37 : i32 to index
    %39 = memref.load %arg1[%38] : memref<16xi32, #tpu.memory_space<smem>>
    %40 = arith.index_cast %39 : i32 to index
    %c0_10 = arith.constant 0 : index
    %41 = vector.load %arg2[%40, %c0_10] : memref<33x32xf32, #tpu.memory_space<vmem>>, vector<1x32xf32>
    %cst_11 = arith.constant 5.65685415 : f32
    %42 = vector.broadcast %cst_11 : f32 to vector<1x32xf32>
    %43 = arith.mulf %41, %42 : vector<1x32xf32>
    %44 = arith.index_cast %c4_i32 : i32 to index
    %c0_12 = arith.constant 0 : index
    %45 = vector.load %arg3[%44, %c0_12] : memref<8x32xf32, #tpu.memory_space<vmem>>, vector<1x32xf32>
    tpu.vector_store %arg3[%44, %c0_12], %43 {strides = array<i32>} : memref<8x32xf32, #tpu.memory_space<vmem>>, vector<1x32xf32>,
    %c5_i32 = arith.constant 5 : i32
    %46 = arith.addi %0, %c5_i32 : i32
    %47 = arith.index_cast %46 : i32 to index
    %48 = memref.load %arg1[%47] : memref<16xi32, #tpu.memory_space<smem>>
    %49 = arith.index_cast %48 : i32 to index
    %c0_13 = arith.constant 0 : index
    %50 = vector.load %arg2[%49, %c0_13] : memref<33x32xf32, #tpu.memory_space<vmem>>, vector<1x32xf32>
    %cst_14 = arith.constant 5.65685415 : f32
    %51 = vector.broadcast %cst_14 : f32 to vector<1x32xf32>
    %52 = arith.mulf %50, %51 : vector<1x32xf32>
    %53 = arith.index_cast %c5_i32 : i32 to index
    %c0_15 = arith.constant 0 : index
    %54 = vector.load %arg3[%53, %c0_15] : memref<8x32xf32, #tpu.memory_space<vmem>>, vector<1x32xf32>
    tpu.vector_store %arg3[%53, %c0_15], %52 {strides = array<i32>} : memref<8x32xf32, #tpu.memory_space<vmem>>, vector<1x32xf32>,
    %c6_i32 = arith.constant 6 : i32
    %55 = arith.addi %0, %c6_i32 : i32
    %56 = arith.index_cast %55 : i32 to index
    %57 = memref.load %arg1[%56] : memref<16xi32, #tpu.memory_space<smem>>
    %58 = arith.index_cast %57 : i32 to index
    %c0_16 = arith.constant 0 : index
    %59 = vector.load %arg2[%58, %c0_16] : memref<33x32xf32, #tpu.memory_space<vmem>>, vector<1x32xf32>
    %cst_17 = arith.constant 5.65685415 : f32
    %60 = vector.broadcast %cst_17 : f32 to vector<1x32xf32>
    %61 = arith.mulf %59, %60 : vector<1x32xf32>
    %62 = arith.index_cast %c6_i32 : i32 to index
    %c0_18 = arith.constant 0 : index
    %63 = vector.load %arg3[%62, %c0_18] : memref<8x32xf32, #tpu.memory_space<vmem>>, vector<1x32xf32>
    tpu.vector_store %arg3[%62, %c0_18], %61 {strides = array<i32>} : memref<8x32xf32, #tpu.memory_space<vmem>>, vector<1x32xf32>,
    %c7_i32 = arith.constant 7 : i32
    %64 = arith.addi %0, %c7_i32 : i32
    %65 = arith.index_cast %64 : i32 to index
    %66 = memref.load %arg1[%65] : memref<16xi32, #tpu.memory_space<smem>>
    %67 = arith.index_cast %66 : i32 to index
    %c0_19 = arith.constant 0 : index
    %68 = vector.load %arg2[%67, %c0_19] : memref<33x32xf32, #tpu.memory_space<vmem>>, vector<1x32xf32>
    %cst_20 = arith.constant 5.65685415 : f32
    %69 = vector.broadcast %cst_20 : f32 to vector<1x32xf32>
    %70 = arith.mulf %68, %69 : vector<1x32xf32>
    %71 = arith.index_cast %c7_i32 : i32 to index
    %c0_21 = arith.constant 0 : index
    %72 = vector.load %arg3[%71, %c0_21] : memref<8x32xf32, #tpu.memory_space<vmem>>, vector<1x32xf32>
    tpu.vector_store %arg3[%71, %c0_21], %70 {strides = array<i32>} : memref<8x32xf32, #tpu.memory_space<vmem>>, vector<1x32xf32>,
    %c8_i32_22 = arith.constant 8 : i32
    return
  }
  func.func @transform_0(%arg0: i32, %arg1: memref<16xi32, #tpu.memory_space<smem>>) -> (i32, i32) {
    %c0_i32 = arith.constant 0 : i32
    %c0_i32_0 = arith.constant 0 : i32
    %c0_i32_1 = arith.constant 0 : i32
    return %c0_i32, %c0_i32_0 : i32, i32
  }
  func.func @transform_1(%arg0: i32, %arg1: memref<16xi32, #tpu.memory_space<smem>>) -> (i32, i32) {
    %c0_i32 = arith.constant 0 : i32
    %c0_i32_0 = arith.constant 0 : i32
    return %arg0, %c0_i32 : i32, i32
  }
}

</mosaic_0001>

<bundles_post_ra>
// kernel: tpu_custom_call.1
= control target key start
LH: loop header
LB: loop body
LE: loop exit
PB: predicated region body
PF: predicated region fallthrough
CT: control target
= control target key end

     0   :  { %s501_s0 = inlined_call_operand.vmem [shape: s32[16], index: 0, kind: input, shape index: {}]   ;;  %s502_s1 = inlined_call_operand.vmem [shape: f32[33,32], index: 1, kind: input, shape index: {}]   ;;  %s503_s2 = inlined_call_operand.hbm [shape: f32[16,32], index: 2, kind: output, shape index: {}]  }
   0x1   :  { %s7_s11 = sshll.u32 %s501_s0, 4  ;;  %s8_s11 = int_to_ptr.vmem [resolvable:$true] %s7_s11 }
   0x2   :  { %s269_s12 = scalar_lea.vmem %s8_s11, 16  ;;  %p274_p1 = scmp.lt.s32.totalorder %s8_s11, %s8_s11 }
   0x3   :  { %p270_p0 = scmp.ne.s32.totalorder %s8_s11, %s269_s12  ;;  %p275_p2 = scmp.lt.s32.totalorder %s269_s12, %s269_s12 }
   0x5   :  { %p276_p3 = por %p275_p2, %p274_p1 }
   0x7   :  { %p277_p4 = pnand %p276_p3, %p270_p0 }
   0x9   :  { %280 = shalt.err (!%p277_p4)  }
   0xa   :  { %s345_s13 = smov [#allocation3]  }
   0xb   :  { %10 = dma.vmem_to_smem %s8_s11, 16, %s345_s13, [#allocation2] }
   0xc   :  { %323 = dma.done.wait [#allocation2], 16 }
   0xd   :  { %324 = vsyncadd [#allocation2], 4294967280 }
   0xe   :  { %12 = sfence }
   0xf   :  { %13 = vsyncpa [#allocation5], 0 }
  0x10   :  { %15 = vsyncpa [#allocation5 + $0x1], 0  ;;  %s365_s14 = smov 0   ;;  %s367_s15 = smov 0  }
  0x11   :  { %s369_s0 = smov 0   ;;  %s371_s16 = smov 0  }
  0x12 LB: > { %s386_s17 = sadd.s32 4294967295, %s343_s16   ;;  %s220_s18 = sadd.s32 4294967294, %s343_s16   ;;  %s343_s16 = sphi %s371_s16, %s513_s16   ;;  %s339_s0 = sphi %s369_s0, %s512_s0   ;;  %s335_s15 = sphi %s367_s15, %s511_s15   ;;  %s331_s14 = sphi %s365_s14, %s510_s14  }
  0x13   : > { %s390_s19 = sadd.s32 1, %s343_s16   ;;  %s49_s20 = sadd.s32 1, %s339_s0 }
  0x14   : > { %s46_s21 = ssub.s32 %s343_s16, %s390_s19  ;;  %p59_p5 = scmp.ne.s32.totalorder %s339_s0, %s335_s15 }
  0x15   : > { %p47_p6 = scmp.eq.s32.totalorder %s46_s21, 0  ;;  %p60_p7 = scmp.eq.s32.totalorder %s386_s17, 1 }
  0x16   : > { %p65_p8 = scmp.ne.s32.totalorder %s335_s15, %s331_s14  ;;  %p66_p9 = scmp.eq.s32.totalorder %s220_s18, 1 }
  0x17   : > { %s401_s22 = scalar_select %p47_p6, %s339_s0, %s49_s20  }
  0x18   : > { %p403_p10 = por %p60_p7, %p59_p5  ;;  %p407_p11 = por %p66_p9, %p65_p8 }
  0x19   : > { %505 = sst [smem:[#allocation8_spill]] %s401_s22  ;;  %p222_p12 = scmp.ge.s32.totalorder %s343_s16, 1 }
  0x1a   : > { %p87_p13 = scmp.lt.s32.totalorder %s343_s16, 3 }
  0x1c   : > { %p88_p0 = pnand %p222_p12, %p87_p13 }
  0x1d   : > { %s504_s25 = sand.u32 (!%p88_p0), 1, %s335_s15   ;;  %s224_s26 = sshll.u32 (!%p88_p0), %s386_s17, 3 }
  0x1e   : > { %91 = sbr.rel (%p88_p0) target bundleno = 70 (0x46), region = 24  ;;  %s223_s27 = sshll.u32 (!%p88_p0), %s504_s25, 3 }
  0x1f   : > { %s103_s28 = sld [smem:[#allocation3 + %s224_s26]] (!%p88_p0)  ;;  %s109_s29 = sadd.s32 (!%p88_p0), 1, %s224_s26 }
  0x20   : > { %s115_s30 = sadd.s32 (!%p88_p0), 2, %s224_s26  ;;  %s110_s3 = sld [smem:[#allocation3 + %s109_s29]] (!%p88_p0) }
  0x21   : > { %s121_s4 = sadd.s32 (!%p88_p0), 3, %s224_s26  ;;  %s116_s5 = sld [smem:[#allocation3 + %s115_s30]] (!%p88_p0) }
  0x22   : > { %s127_s6 = sadd.s32 (!%p88_p0), 4, %s224_s26  ;;  %s122_s7 = sld [smem:[#allocation3 + %s121_s4]] (!%p88_p0) }
  0x23   : > { %s133_s8 = sadd.s32 5, %s224_s26  ;;  %s128_s12 = sld [smem:[#allocation3 + %s127_s6]]  ;;  %vm107_vm0 = vcmask 253952  }
  0x24   : > { %s134_s13 = sld [smem:[#allocation3 + %s133_s8]]  ;;  %s139_s18 = sadd.s32 6, %s224_s26 }
  0x25   : > { %s104_s11 = scalar_lea.vmem %s502_s1, %s103_s28  ;;  %s140_s20 = sld [smem:[#allocation3 + %s139_s18]] }
  0x26   : > { %v105_v0 = vld [vmem:[%s104_s11] sm:$0x1]  ;;  %s145_s21 = sadd.s32 7, %s224_s26  ;;  %s111_s29 = scalar_lea.vmem %s502_s1, %s110_s3 }
  0x27   : > { %v106_v1 = vmul.f32 5.656854, %v105_v0  ;;  %s146_s30 = sld [smem:[#allocation3 + %s145_s21]]  ;;  %s423_s4 = scalar_lea.vmem [#allocation4], %s223_s27  ;;  %v112_v2 = vld [vmem:[%s111_s29] sm:$0x1] }
  0x28   : > { %s117_s8 = scalar_lea.vmem %s502_s1, %s116_s5  ;;  %v113_v3 = vmul.f32 5.656854, %v112_v2  ;;  %s123_s26 = scalar_lea.vmem %s502_s1, %s122_s7 }
  0x29   : > { %108 = vst.msk [vmem:[%s423_s4] sm:$0x1] %vm107_vm0, %v106_v1  ;;  %v118_v4 = vld [vmem:[%s117_s8] sm:$0x1]  ;;  %s129_s9 = scalar_lea.vmem %s502_s1, %s128_s12  ;;  %s226_s18 = sshll.u32 %s386_s17, 7 }
  0x2a   : > { %v119_v5 = vmul.f32 5.656854, %v118_v4  ;;  %v124_v6 = vld [vmem:[%s123_s26] sm:$0x1]  ;;  %114 = vst.msk [vmem:[%s423_s4 + $0x1] sm:$0x1] %vm107_vm0, %v113_v3  ;;  %s135_s11 = scalar_lea.vmem %s502_s1, %s134_s13 }
  0x2b   : > { %v125_v7 = vmul.f32 5.656854, %v124_v6  ;;  %v130_v8 = vld [vmem:[%s129_s9] sm:$0x1]  ;;  %s141_s12 = scalar_lea.vmem %s502_s1, %s140_s20  ;;  %s165_s29 = sshll.u32 %s423_s4, 4  ;;  %s166_s29 = int_to_ptr.vmem [resolvable:$true] %s165_s29 }
  0x2c   : > { %120 = vst.msk [vmem:[%s423_s4 + $0x2] sm:$0x1] %vm107_vm0, %v119_v5  ;;  %v131_v9 = vmul.f32 5.656854, %v130_v8  ;;  %v136_v10 = vld [vmem:[%s135_s11] sm:$0x1]  ;;  %s460_s20 = scalar_lea.hbm %s503_s2, %s226_s18 }
  0x2d   : > { %126 = vst.msk [vmem:[%s423_s4 + $0x3] sm:$0x1] %vm107_vm0, %v125_v7  ;;  %v137_v11 = vmul.f32 5.656854, %v136_v10  ;;  %v142_v12 = vld [vmem:[%s141_s12] sm:$0x1]  ;;  %s147_s17 = scalar_lea.vmem %s502_s1, %s146_s30 }
  0x2e   : > { %132 = vst.msk [vmem:[%s423_s4 + $0x4] sm:$0x1] %vm107_vm0, %v131_v9  ;;  %v143_v13 = vmul.f32 5.656854, %v142_v12  ;;  %v148_v14 = vld [vmem:[%s147_s17] sm:$0x1] }
  0x2f   : > { %138 = vst.msk [vmem:[%s423_s4 + $0x5] sm:$0x1] %vm107_vm0, %v137_v11  ;;  %v149_v15 = vmul.f32 5.656854, %v148_v14  ;;  %s508_s22 = sand.u32 1, %s335_s15   ;;  %s281_s30 = scalar_lea.vmem %s166_s29, 128 }
  0x30   : > { %144 = vst.msk [vmem:[%s423_s4 + $0x6] sm:$0x1] %vm107_vm0, %v143_v13  ;;  %s152_s25 = scalar_lea.sflag [#allocation5], %s508_s22  ;;  %p282_p1 = scmp.ne.s32.totalorder %s166_s29, %s281_s30 }
  0x31   : > { %150 = vst.msk [vmem:[%s423_s4 + $0x7] sm:$0x1] %vm107_vm0, %v149_v15  ;;  %s346_s26 = smov [#allocation4]  }
  0x32   : > { %p283_p2 = pnand %p282_p1, %p403_p10  ;;  %s285_s27 = sshll.u32 %s346_s26, 4  ;;  %s286_s27 = int_to_ptr.vmem [resolvable:$false] %s285_s27 }
  0x33   : > { %s287_s3 = scalar_lea.vmem %s286_s27, 256  ;;  %p288_p4 = scmp.lt.s32.totalorder %s166_s29, %s286_s27 }
  0x34   : > { %p284_p3 = pneg %p283_p2  ;;  %p289_p5 = scmp.lt.s32.totalorder %s287_s3, %s281_s30 }
  0x36   : > { %p290_p6 = por %p289_p5, %p288_p4 }
  0x38   : > { %p291_p7 = pnand %p290_p6, %p284_p3 }
  0x3a   : > { %294 = shalt.err (!%p291_p7)
}
  0x3b   : > { %s295_s4 = scalar_lea.hbm %s460_s20, 128  ;;  %s299_s10 = scalar_lea.hbm %s503_s2, 256 }
  0x3c   : > { %p296_p8 = scmp.ne.s32.totalorder %s460_s20, %s295_s4  ;;  %p300_p13 = scmp.lt.s32.totalorder %s460_s20, %s503_s2 }
  0x3d   : > { %p301_p0 = scmp.lt.s32.totalorder %s299_s10, %s295_s4 }
  0x3e   : > { %p297_p9 = pnand %p296_p8, %p403_p10 }
  0x3f   : > { %p302_p1 = por %p301_p0, %p300_p13 }
  0x40   : > { %p298_p12 = pneg %p297_p9 }
  0x42   : > { %p303_p2 = pnand %p302_p1, %p298_p12 }
  0x44   : > { %306 = shalt.err (!%p303_p2)
}
  0x45   : > { %229 = dma.vmem_to_hbm [thread:$0]  (%p403_p10), %s166_s29, 128, %s460_s20, %s152_s25  }
  0x46 PF: > { %p235_p3 = scmp.ge.s32.totalorder %s343_s16, 2  ;;  %s177_s7 = sand.u32 1, %s331_s14  }
  0x47   : > { %s178_s21 = scalar_lea.sflag [#allocation5], %s177_s7 }
  0x48   : > { %p232_p4 = pnand %p235_p3, %p407_p11 }
  0x4a   : > { %p233_p5 = pneg %p232_p4 }
  0x4c   : > { %326 = dma.done.wait (%p233_p5), %s178_s21, 128  }
  0x4d   : > { %328 = vsyncadd (%p233_p5), %s178_s21, 4294967168  ;;  %s509_s12 = sld [smem:[#allocation8_spill]]  ;;  %p18_p6 = scmp.ge.s32.totalorder %s390_s19, 4  }
  0x4e   : > { %s510_s14 = smov %s335_s15  ;;  %s511_s15 = smov %s339_s0 }
  0x4f   : > { %s513_s16 = smov %s390_s19  ;;  %20 = sbr.rel (!%p18_p6) target bundleno = 18 (0x12), region = 64 }
  0x53   : > { %s512_s0 = smov %s509_s12 }
  0x54   :  { %183 = vsyncpa [#allocation5], 1 }
  0x55   :  { %185 = vsyncpa [#allocation5 + $0x1], 1 }

</bundles_post_ra>
